<compile_context>
chip_gen: v7x
topology: tpu7x:2x2x1
jax: 0.10.0
libtpu: 0.0.40
codegen_flags: <defaults>
</compile_context>

<pallas_src>
import math
from functools import partial

import jax
import jax.numpy as jnp
from jax.experimental import pallas as pl
from jax.experimental.pallas import tpu as pltpu


def se_kernel(x_ref, wsq_ref, bsq_ref, wex_ref, bex_ref, o_ref, *, inv_hw):
    """Fused squeeze-excitation for one block of NB batch elements.

    x_ref  : (NB, C, HWp) input tile; channels on sublanes, padded spatial on lanes
    wsq_ref: (C, R)  squeeze 1x1-conv weight, pre-transposed to (in, out)
    bsq_ref: (1, R)  squeeze bias
    wex_ref: (R, C)  excite 1x1-conv weight, pre-transposed to (in, out)
    bex_ref: (1, C)  excite bias
    o_ref  : (NB, C, HWp) output
    """
    # Global average pool over the (zero-padded) lane axis, accumulated in f32.
    # Padded lanes are zeros, so dividing by the *true* H*W gives the exact mean.
    pooled = jnp.sum(x_ref[...].astype(jnp.float32), axis=-1) * inv_hw        # (NB, C)

    # Squeeze: one batched MXU matmul + bias + ReLU.
    s = jnp.dot(pooled, wsq_ref[...],
                preferred_element_type=jnp.float32) + bsq_ref[...]            # (NB, R)
    s = jnp.maximum(s, 0.0)

    # Excite: batched matmul + bias + sigmoid (exp lowers to the EUP slot).
    e = jnp.dot(s, wex_ref[...],
                preferred_element_type=jnp.float32) + bex_ref[...]            # (NB, C)
    scale = jax.nn.sigmoid(e)                                                 # (NB, C)

    # Channel-wise rescale. Re-read x_ref here (instead of reusing one large live
    # value) so Mosaic reloads from VMEM and avoids vreg spills; store stays
    # lane-dense because HWp is a multiple of 128.
    o_ref[...] = (x_ref[...].astype(jnp.float32) * scale[..., None]).astype(o_ref.dtype)


def squeeze_excitation(x_nchw, params, *, target_tile_bytes=1 << 20, min_steps=8):
    """x_nchw: (N, C, H, W). Returns (N, C, H, W) matching the PyTorch module."""
    N, C, H, W = x_nchw.shape
    HW = H * W
    R = params["w_sq"].shape[0]
    dtype = x_nchw.dtype

    # --- layout: NCHW -> (N, C, HW), pad lanes to a multiple of 128 -------------
    HWp = ((HW + 127) // 128) * 128
    x2 = x_nchw.reshape(N, C, HW)
    if HWp != HW:
        x2 = jnp.pad(x2, ((0, 0), (0, 0), (0, HWp - HW)))

    # --- batch blocking: ~1 MiB tiles, but keep >= min_steps grid steps ---------
    per_batch_bytes = C * HWp * jnp.dtype(dtype).itemsize
    nb = max(1, target_tile_bytes // per_batch_bytes)
    if N >= min_steps:
        nb = min(nb, max(1, N // min_steps))
    nb = int(min(nb, N))
    Np = ((N + nb - 1) // nb) * nb
    if Np != N:
        x2 = jnp.pad(x2, ((0, Np - N), (0, 0), (0, 0)))

    # Pre-transpose weights once on the host side so the kernel does
    # (NB, C) @ (C, R) and (NB, R) @ (R, C) with no in-kernel transposes.
    wsq_t = params["w_sq"].T.astype(jnp.float32)          # (C, R)
    wex_t = params["w_ex"].T.astype(jnp.float32)          # (R, C)
    bsq = params["b_sq"].reshape(1, R).astype(jnp.float32)
    bex = params["b_ex"].reshape(1, C).astype(jnp.float32)

    kernel = partial(se_kernel, inv_hw=1.0 / float(HW))
    out = pl.pallas_call(
        kernel,
        out_shape=jax.ShapeDtypeStruct((Np, C, HWp), dtype),
        grid=(Np // nb,),
        in_specs=[
            pl.BlockSpec((nb, C, HWp), lambda n: (n, 0, 0)),   # batch-blocked x tile
            pl.BlockSpec((C, R), lambda n: (0, 0)),            # squeeze weight (resident)
            pl.BlockSpec((1, R), lambda n: (0, 0)),            # squeeze bias
            pl.BlockSpec((R, C), lambda n: (0, 0)),            # excite weight (resident)
            pl.BlockSpec((1, C), lambda n: (0, 0)),            # excite bias
        ],
        out_specs=pl.BlockSpec((nb, C, HWp), lambda n: (n, 0, 0)),
        compiler_params=pltpu.CompilerParams(
            dimension_semantics=("parallel",)),                # batch blocks across TCs
    )(x2, wsq_t, bsq, wex_t, bex)

    out = out[:N, :, :HW]
    return out.reshape(N, C, H, W)


def init_se_params(key, channels, reduction=8):
    """Deterministic params mirroring Conv2d(C,R,1)/Conv2d(R,C,1) weight+bias."""
    reduced = int(math.ceil(channels / reduction))
    k1, k2, k3, k4 = jax.random.split(key, 4)
    return {
        "w_sq": 0.1 * jax.random.normal(k1, (reduced, channels), jnp.float32),
        "b_sq": 0.1 * jax.random.normal(k2, (reduced,), jnp.float32),
        "w_ex": 0.1 * jax.random.normal(k3, (channels, reduced), jnp.float32),
        "b_ex": 0.1 * jax.random.normal(k4, (channels,), jnp.float32),
    }


if __name__ == "__main__":
    key = jax.random.PRNGKey(0)
    k_x, k_p = jax.random.split(key)

    N, C, H, W = 2, 32, 16, 16
    REDUCTION = 8

    x = jax.random.normal(k_x, (N, C, H, W), jnp.float32)
    params = init_se_params(k_p, C, REDUCTION)

    out = jax.jit(squeeze_excitation)(x, params)
    out = jax.block_until_ready(out)
    assert out.shape == (N, C, H, W), out.shape

    # Pure-JAX reference of the PyTorch forward:
    # avg_pool -> relu(squeeze) -> sigmoid(excite) -> x * y.
    pooled = jnp.mean(x, axis=(2, 3))                                        # (N, C)
    s = jnp.maximum(pooled @ params["w_sq"].T + params["b_sq"], 0.0)         # (N, R)
    y = jax.nn.sigmoid(s @ params["w_ex"].T + params["b_ex"])                # (N, C)
    ref = x * y[:, :, None, None]
    assert jnp.allclose(out, ref, rtol=1e-5, atol=1e-5), float(jnp.max(jnp.abs(out - ref)))

    print("KERNEL_OK")
</pallas_src>

<mosaic_0001>
module attributes {stable_mosaic.version = 11 : i64} {
  func.func @se_kernel(%arg0: i32, %arg1: memref<2x32x256xf32, #tpu.memory_space<vmem>>, %arg2: memref<32x4xf32, #tpu.memory_space<vmem>>, %arg3: memref<1x4xf32, #tpu.memory_space<vmem>>, %arg4: memref<4x32xf32, #tpu.memory_space<vmem>>, %arg5: memref<1x32xf32, #tpu.memory_space<vmem>>, %arg6: memref<2x32x256xf32, #tpu.memory_space<vmem>>) attributes {dimension_semantics = [#tpu.dimension_semantics<parallel>], iteration_bounds = array<i64: 1>, scalar_prefetch = 0 : i64, scratch_operands = 0 : i64, tpu.core_type = #tpu.core_type<tc>, window_params = [{transform_indices = @transform_0, window_bounds = array<i64: 2, 32, 256>}, {pipeline_mode = #tpu.pipeline_mode<synchronous>, transform_indices = @transform_1, window_bounds = array<i64: 32, 4>}, {pipeline_mode = #tpu.pipeline_mode<synchronous>, transform_indices = @transform_2, window_bounds = array<i64: 1, 4>}, {pipeline_mode = #tpu.pipeline_mode<synchronous>, transform_indices = @transform_3, window_bounds = array<i64: 4, 32>}, {pipeline_mode = #tpu.pipeline_mode<synchronous>, transform_indices = @transform_4, window_bounds = array<i64: 1, 32>}, {transform_indices = @transform_5, window_bounds = array<i64: 2, 32, 256>}]} {
    %c0 = arith.constant 0 : index
    %c0_0 = arith.constant 0 : index
    %c0_1 = arith.constant 0 : index
    %0 = vector.load %arg1[%c0, %c0_0, %c0_1] : memref<2x32x256xf32, #tpu.memory_space<vmem>>, vector<2x32x256xf32>
    %cst = arith.constant dense<0.000000e+00> : vector<2x32xf32>
    %1 = vector.multi_reduction <add>, %0, %cst [2] : vector<2x32x256xf32> to vector<2x32xf32>
    %cst_2 = arith.constant 3.906250e-03 : f32
    %2 = vector.broadcast %cst_2 : f32 to vector<2x32xf32>
    %3 = arith.mulf %1, %2 : vector<2x32xf32>
    %c0_3 = arith.constant 0 : index
    %c0_4 = arith.constant 0 : index
    %4 = vector.load %arg2[%c0_3, %c0_4] : memref<32x4xf32, #tpu.memory_space<vmem>>, vector<32x4xf32>
    %cst_5 = arith.constant dense<0.000000e+00> : vector<2x4xf32>
    %5 = tpu.matmul %3, %4, %cst_5 {dimension_numbers = #tpu.dot_dimension_numbers<[1], [0], [0], [1], [0, 0, 1, 1], [], []>} : vector<2x32xf32>, vector<32x4xf32>, vector<2x4xf32> -> vector<2x4xf32>
    %c0_6 = arith.constant 0 : index
    %c0_7 = arith.constant 0 : index
    %6 = vector.load %arg3[%c0_6, %c0_7] : memref<1x4xf32, #tpu.memory_space<vmem>>, vector<1x4xf32>
    %7 = vector.broadcast %6 : vector<1x4xf32> to vector<2x4xf32>
    %8 = arith.addf %5, %7 : vector<2x4xf32>
    %cst_8 = arith.constant 0.000000e+00 : f32
    %9 = vector.broadcast %cst_8 : f32 to vector<2x4xf32>
    %10 = arith.maximumf %8, %9 : vector<2x4xf32>
    %c0_9 = arith.constant 0 : index
    %c0_10 = arith.constant 0 : index
    %11 = vector.load %arg4[%c0_9, %c0_10] : memref<4x32xf32, #tpu.memory_space<vmem>>, vector<4x32xf32>
    %cst_11 = arith.constant dense<0.000000e+00> : vector<2x32xf32>
    %12 = tpu.matmul %10, %11, %cst_11 {dimension_numbers = #tpu.dot_dimension_numbers<[1], [0], [0], [1], [0, 0, 1, 1], [], []>} : vector<2x4xf32>, vector<4x32xf32>, vector<2x32xf32> -> vector<2x32xf32>
    %c0_12 = arith.constant 0 : index
    %c0_13 = arith.constant 0 : index
    %13 = vector.load %arg5[%c0_12, %c0_13] : memref<1x32xf32, #tpu.memory_space<vmem>>, vector<1x32xf32>
    %14 = vector.broadcast %13 : vector<1x32xf32> to vector<2x32xf32>
    %15 = arith.addf %12, %14 : vector<2x32xf32>
    %16 = arith.negf %15 : vector<2x32xf32>
    %17 = math.exp %16 : vector<2x32xf32>
    %cst_14 = arith.constant 1.000000e+00 : f32
    %18 = vector.broadcast %cst_14 : f32 to vector<2x32xf32>
    %19 = arith.addf %18, %17 : vector<2x32xf32>
    %20 = arith.divf %18, %19 : vector<2x32xf32>
    %c0_15 = arith.constant 0 : index
    %c0_16 = arith.constant 0 : index
    %c0_17 = arith.constant 0 : index
    %21 = vector.load %arg1[%c0_15, %c0_16, %c0_17] : memref<2x32x256xf32, #tpu.memory_space<vmem>>, vector<2x32x256xf32>
    %22 = vector.shape_cast %20 : vector<2x32xf32> to vector<2x32x1xf32>
    %23 = vector.broadcast %22 : vector<2x32x1xf32> to vector<2x32x256xf32>
    %24 = arith.mulf %21, %23 : vector<2x32x256xf32>
    %c0_18 = arith.constant 0 : index
    %c0_19 = arith.constant 0 : index
    %c0_20 = arith.constant 0 : index
    %25 = vector.load %arg6[%c0_18, %c0_19, %c0_20] : memref<2x32x256xf32, #tpu.memory_space<vmem>>, vector<2x32x256xf32>
    tpu.vector_store %arg6[%c0_18, %c0_19, %c0_20], %24 {strides = array<i32>} : memref<2x32x256xf32, #tpu.memory_space<vmem>>, vector<2x32x256xf32>,
    return
  }
  func.func @transform_0(%arg0: i32) -> (i32, i32, i32) {
    %c0_i32 = arith.constant 0 : i32
    %c0_i32_0 = arith.constant 0 : i32
    %c0_i32_1 = arith.constant 0 : i32
    return %arg0, %c0_i32, %c0_i32_0 : i32, i32, i32
  }
  func.func @transform_1(%arg0: i32) -> (i32, i32) {
    %c0_i32 = arith.constant 0 : i32
    %c0_i32_0 = arith.constant 0 : i32
    %c0_i32_1 = arith.constant 0 : i32
    return %c0_i32, %c0_i32_0 : i32, i32
  }
  func.func @transform_2(%arg0: i32) -> (i32, i32) {
    %c0_i32 = arith.constant 0 : i32
    %c0_i32_0 = arith.constant 0 : i32
    %c0_i32_1 = arith.constant 0 : i32
    return %c0_i32, %c0_i32_0 : i32, i32
  }
  func.func @transform_3(%arg0: i32) -> (i32, i32) {
    %c0_i32 = arith.constant 0 : i32
    %c0_i32_0 = arith.constant 0 : i32
    %c0_i32_1 = arith.constant 0 : i32
    return %c0_i32, %c0_i32_0 : i32, i32
  }
  func.func @transform_4(%arg0: i32) -> (i32, i32) {
    %c0_i32 = arith.constant 0 : i32
    %c0_i32_0 = arith.constant 0 : i32
    %c0_i32_1 = arith.constant 0 : i32
    return %c0_i32, %c0_i32_0 : i32, i32
  }
  func.func @transform_5(%arg0: i32) -> (i32, i32, i32) {
    %c0_i32 = arith.constant 0 : i32
    %c0_i32_0 = arith.constant 0 : i32
    %c0_i32_1 = arith.constant 0 : i32
    return %arg0, %c0_i32, %c0_i32_0 : i32, i32, i32
  }
}

</mosaic_0001>

<bundles_post_ra>
// kernel: squeeze_excitation.1
= control target key start
LH: loop header
LB: loop body
LE: loop exit
PB: predicated region body
PF: predicated region fallthrough
CT: control target
= control target key end

     0   :  { %v417_v27 = vmov 0.0|0.0   ;;  %vm418_vm0 = vmmov 0   ;;  %v419_v31 = vmov 0.0   ;;  %v87_v32 = vlaneseq  ;;  %s639_s0 = inlined_call_operand.vmem [shape: f32[2,32,256], index: 0, kind: input, shape index: {}]   ;;  %s640_s1 = inlined_call_operand.vmem [shape: f32[32,4], index: 1, kind: input, shape index: {}]   ;;  %s641_s3 = inlined_call_operand.vmem [shape: f32[4,32], index: 3, kind: input, shape index: {}]   ;;  %s642_s2 = inlined_call_operand.vmem [shape: f32[1,4], index: 2, kind: input, shape index: {}]   ;;  %s643_s4 = inlined_call_operand.vmem [shape: f32[1,32], index: 4, kind: input, shape index: {}]   ;;  %s644_s5 = inlined_call_operand.vmem [shape: f32[2,32,256], index: 5, kind: output, shape index: {}]  }
   0x1   :  { %v453_v0 = vld [vmem:[%s639_s0 + $0x40] sm:$0xff]  ;;  %v458_v1 = vld [vmem:[%s639_s0 + $0x48] sm:$0xff]  ;;  %v475_v5 = vld [vmem:[%s639_s0 + $0x50] sm:$0xff]  ;;  %404 = vmatprep.subr.bf16.mxu0 %v417_v27  ;;  %396 = vmatprep.mubr.msk.f32.mxu0 %vm418_vm0, %v419_v31  ;;  %vm98_vm1 = vcmask 130112   ;;  %vm105_vm2 = vcmask 195712   ;;  %vm112_vm3 = vcmask 261312  }
   0x2   :  { %v463_v2 = vld [vmem:[%s639_s0] sm:$0xff]  ;;  %v48_v3 = vadd.f32 %v458_v1, %v453_v0  ;;  %v470_v4 = vld [vmem:[%s639_s0 + $0x8] sm:$0xff]  ;;  %v480_v6 = vld [vmem:[%s639_s0 + $0x58] sm:$0xff]  ;;  %399 = vmatprep.subr.mxu1 %v419_v31  ;;  %401 = vmatprep.mubr.msk.f32.mxu1 %vm418_vm0, %v419_v31  ;;  %v88_v34 = vand.u32 127, %v87_v32  ;;  %v558_v39 = vshrl.u32 %v87_v32, 7  ;;  %vm133_vm4 = vcmask 1041409  }
   0x3   :  { %v36_v7 = vadd.f32 %v470_v4, %v463_v2  ;;  %v487_v8 = vld [vmem:[%s639_s0 + $0x10] sm:$0xff]  ;;  %v492_v9 = vld [vmem:[%s639_s0 + $0x18] sm:$0xff]  ;;  %v51_v10 = vadd.f32 %v480_v6, %v475_v5  ;;  %v501_v12 = vld [vmem:[%s639_s0 + $0x60] sm:$0xff]  ;;  %vm135_vm5 = vcmask 261120   ;;  %vm221_vm6 = vcmask 1043456  }
   0x4   :  { %49 = vadd.xlane.f32.xlu1 %v48_v3  ;;  %v39_v11 = vadd.f32 %v492_v9, %v487_v8  ;;  %v506_v13 = vld [vmem:[%s639_s0 + $0x68] sm:$0xff]  ;;  %v511_v14 = vld [vmem:[%s639_s0 + $0x20] sm:$0xff]  ;;  %v525_v18 = vld [vmem:[%s639_s0 + $0x70] sm:$0xff]  ;;  %v93_v36 = vadd.s32 4294967288, %v88_v34  ;;  %v100_v38 = vadd.s32 4294967280, %v88_v34  ;;  %v107_v43 = vadd.s32 4294967272, %v88_v34 }
   0x5   :  { %37 = vadd.xlane.f32.xlu0 %v36_v7  ;;  %v516_v15 = vld [vmem:[%s639_s0 + $0x28] sm:$0xff]  ;;  %v54_v16 = vadd.f32 %v506_v13, %v501_v12  ;;  %v530_v19 = vld [vmem:[%s639_s0 + $0x78] sm:$0xff]  ;;  %v535_v20 = vld [vmem:[%s639_s0 + $0x30] sm:$0xff]  ;;  %v91_v47 = vsub.s32 %v88_v34, %v558_v39  ;;  %vm217_vm7 = vcmask 31744  }
   0x6   :  { %v42_v17 = vadd.f32 %v516_v15, %v511_v14  ;;  %v540_v21 = vld [vmem:[%s639_s0 + $0x38] sm:$0xff]  ;;  %v57_v22 = vadd.f32 %v530_v19, %v525_v18  ;;  %v68_v24 = vld [vmem:[%s640_s1] sm:$0xff]  ;;  %v69_v25 = vld [vmem:[%s640_s1 + $0x8] sm:$0xff]  ;;  %v96_v41 = vsub.s32 %v93_v36, %v558_v39  ;;  %v103_v45 = vsub.s32 %v100_v38, %v558_v39 }
   0x7   :  { %v45_v23 = vadd.f32 %v540_v21, %v535_v20  ;;  %v405_v26 = vpack.c.bf16 %v69_v25, %v68_v24  ;;  %v70_v28 = vld [vmem:[%s640_s1 + $0x10] sm:$0xff]  ;;  %v71_v29 = vld [vmem:[%s640_s1 + $0x18] sm:$0xff]  ;;  %v110_v54 = vsub.s32 %v107_v43, %v558_v39  ;;  %v209_v25 = vld [vmem:[%s641_s3] sm:$0xf]  ;;  %v303_v38 = vsub.s32 0, %v558_v39 }
   0x8   :  { %52 = vadd.xlane.f32.xlu1 %v51_v10  ;;  %v408_v30 = vpack.c.bf16 %v71_v29, %v70_v28  ;;  %400 = vmatpush3.msk.msra.mxu1 %vm221_vm6, %v209_v25  ;;  %v377_v31 = vld [vmem:[%s643_s4] ss:$0 sm:$0xff] }
   0x9   :  { %40 = vadd.xlane.f32.xlu0 %v39_v11  ;;  %406 = vmatpush3.bf16.msra.mxu0 %v405_v26  ;;  %v375_v26 = vld [vmem:[%s642_s2] ss:$0 sm:$0xff] }
   0xa   :  { %407 = vmatprep.subr.bf16.mxu0 %v417_v27 }
   0xc   :  { %55 = vadd.xlane.f32.xlu1 %v54_v16 }
   0xd   :  { %43 = vadd.xlane.f32.xlu0 %v42_v17  ;;  %409 = vmatpush3.bf16.msra.mxu0 %v408_v30 }
  0x10   :  { %58 = vadd.xlane.f32.xlu1 %v57_v22 }
  0x11   :  { %46 = vadd.xlane.f32.xlu0 %v45_v23 }
  0x91   :  { %v50_v33 = vpop.xlane.xlu1 %49 }
  0x92   :  { %v38_v35 = vpop.xlane.xlu0 %37  ;;  %v64_v48 = vmul.f32 0.00390625, %v50_v33 }
  0x93   :  { %v60_v51 = vmul.f32 0.00390625, %v38_v35 }
  0x94   :  { %v117_v58 = vrot.slane %v64_v48, %v91_v47 }
  0x95   :  { %v53_v37 = vpop.xlane.xlu1 %52  ;;  %v92_v62 = vrot.slane %v60_v51, %v91_v47 }
  0x96   :  { %v41_v40 = vpop.xlane.xlu0 %40  ;;  %v65_v42 = vmul.f32 0.00390625, %v53_v37 }
  0x97   :  { %v61_v44 = vmul.f32 0.00390625, %v41_v40 }
  0x98   :  { %v121_v53 = vrot.slane %v65_v42, %v96_v41  ;;  %v322_v42 = vsub.s32 1, %v558_v39 }
  0x99   :  { %v56_v46 = vpop.xlane.xlu1 %55  ;;  %v97_v55 = vrot.slane %v61_v44, %v96_v41 }
  0x9a   :  { %v66_v49 = vmul.f32 0.00390625, %v56_v46  ;;  %v44_v50 = vpop.xlane.xlu0 %43  ;;  %v122_v3 = vsel %vm98_vm1, %v121_v53, %v117_v58 }
  0x9b   :  { %v62_v52 = vmul.f32 0.00390625, %v44_v50  ;;  %v99_v10 = vsel %vm98_vm1, %v97_v55, %v92_v62 }
  0x9c   :  { %v126_v56 = vrot.slane %v66_v49, %v103_v45 }
  0x9d   :  { %v59_v57 = vpop.xlane.xlu1 %58  ;;  %v104_v59 = vrot.slane %v62_v52, %v103_v45 }
  0x9e   :  { %v67_v60 = vmul.f32 0.00390625, %v59_v57  ;;  %v47_v61 = vpop.xlane.xlu0 %46  ;;  %v127_v11 = vsel %vm105_vm2, %v126_v56, %v122_v3 }
  0x9f   :  { %v63_v63 = vmul.f32 0.00390625, %v47_v61  ;;  %v106_v17 = vsel %vm105_vm2, %v104_v59, %v99_v10 }
  0xa0   :  { %v131_v7 = vrot.slane %v67_v60, %v110_v54 }
  0xa1   :  { %v111_v16 = vrot.slane %v63_v63, %v110_v54 }
  0xa2   :  { %v132_v22 = vsel %vm112_vm3, %v131_v7, %v127_v11 }
  0xa3   :  { %v113_v23 = vsel %vm112_vm3, %v111_v16, %v106_v17 }
  0xa4   :  { %v134_v24 = vsel %vm133_vm4, %v132_v22, %v113_v23 }
  0xa5   :  { %397 = vmatmul.mubr.msk.f32.vlgmr.msra.gmra.mrb[0].mxu0 %vm135_vm5, %v134_v24 }
 0x178   :  { %v204_v27 = vpop.f32.mrb[0].mxu0 }
 0x179   :  { %v205_v28 = vadd.f32 %v375_v26, %v204_v27  ;;  %v398_v29 = vpop.f32.mrb[1].mxu0 }
 0x17b   :  { %v208_v30 = vmax.f32 %v205_v28, 0.0 }
 0x17d   :  { %402 = vmatmul.mubr.msk.f32.vlgmr.msra.gmra.mrb[0].mxu1 %vm217_vm7, %v208_v30 }
 0x250   :  { %v291_v32 = vpop.f32.mrb[0].mxu1 }
 0x251   :  { %v292_v33 = vadd.f32 %v377_v31, %v291_v32  ;;  %v403_v34 = vpop.f32.mrb[1].mxu1 }
 0x253   :  { %v380_v35 = vmul.f32 -1.442695, %v292_v33 }
 0x255   :  { %413 = vpow2.f32 %v380_v35 }
 0x25f   :  { %v414_v36 = vpop.eup %413 }
 0x260   :  { %v298_v37 = vadd.f32 1.0, %v414_v36 }
 0x262   :  { %415 = vrcp.f32 %v298_v37 }
 0x26c   :  { %v416_v40 = vpop.eup %415 }
 0x26d   :  { %v304_v41 = vrot.slane %v416_v40, %v303_v38  ;;  %v323_v43 = vrot.slane %v416_v40, %v322_v42 }
 0x26f   :  { %310 = vbcast.lane.b32.xlu1 %v304_v41, 264  ;;  %306 = vbcast.lane.b32.xlu0 %v304_v41, 256 }
 0x273   :  { %314 = vbcast.lane.b32.xlu1 %v304_v41, 272  ;;  %325 = vbcast.lane.b32.xlu0 %v323_v43, 256 }
 0x277   :  { %318 = vbcast.lane.b32.xlu1 %v304_v41, 280  ;;  %333 = vbcast.lane.b32.xlu0 %v323_v43, 272 }
 0x27b   :  { %329 = vbcast.lane.b32.xlu1 %v323_v43, 264 }
 0x27f   :  { %337 = vbcast.lane.b32.xlu1 %v323_v43, 280 }
 0x2e1   :  { %v311_v44 = vpop.permute.xlu1 %310  ;;  %v307_v45 = vpop.permute.xlu0 %306 }
 0x2e2   :  { %v341_v46 = vmul.f32 %v311_v44, %v487_v8  ;;  %v342_v47 = vmul.f32 %v311_v44, %v492_v9  ;;  %v339_v48 = vmul.f32 %v307_v45, %v463_v2  ;;  %v340_v49 = vmul.f32 %v307_v45, %v470_v4 }
 0x2e4   :  { %357 = vst [vmem:[%s644_s5 + $0x10] sm:$0xff] %v341_v46  ;;  %358 = vst [vmem:[%s644_s5 + $0x18] sm:$0xff] %v342_v47 }
 0x2e5   :  { %355 = vst [vmem:[%s644_s5] sm:$0xff] %v339_v48  ;;  %356 = vst [vmem:[%s644_s5 + $0x8] sm:$0xff] %v340_v49  ;;  %v315_v8 = vpop.permute.xlu1 %314  ;;  %v326_v2 = vpop.permute.xlu0 %325 }
 0x2e6   :  { %v343_v4 = vmul.f32 %v315_v8, %v511_v14  ;;  %v344_v9 = vmul.f32 %v315_v8, %v516_v15  ;;  %v347_v39 = vmul.f32 %v326_v2, %v453_v0  ;;  %v348_v50 = vmul.f32 %v326_v2, %v458_v1 }
 0x2e8   :  { %359 = vst [vmem:[%s644_s5 + $0x20] sm:$0xff] %v343_v4  ;;  %360 = vst [vmem:[%s644_s5 + $0x28] sm:$0xff] %v344_v9 }
 0x2e9   :  { %363 = vst [vmem:[%s644_s5 + $0x40] sm:$0xff] %v347_v39  ;;  %364 = vst [vmem:[%s644_s5 + $0x48] sm:$0xff] %v348_v50  ;;  %v319_v14 = vpop.permute.xlu1 %318  ;;  %v334_v0 = vpop.permute.xlu0 %333 }
 0x2ea   :  { %v345_v1 = vmul.f32 %v319_v14, %v535_v20  ;;  %v346_v15 = vmul.f32 %v319_v14, %v540_v21  ;;  %v351_v51 = vmul.f32 %v334_v0, %v501_v12  ;;  %v352_v52 = vmul.f32 %v334_v0, %v506_v13 }
 0x2ec   :  { %361 = vst [vmem:[%s644_s5 + $0x30] sm:$0xff] %v345_v1  ;;  %362 = vst [vmem:[%s644_s5 + $0x38] sm:$0xff] %v346_v15 }
 0x2ed   :  { %367 = vst [vmem:[%s644_s5 + $0x60] sm:$0xff] %v351_v51  ;;  %368 = vst [vmem:[%s644_s5 + $0x68] sm:$0xff] %v352_v52  ;;  %v330_v20 = vpop.permute.xlu1 %329 }
 0x2ee   :  { %v349_v12 = vmul.f32 %v330_v20, %v475_v5  ;;  %v350_v13 = vmul.f32 %v330_v20, %v480_v6 }
 0x2f0   :  { %365 = vst [vmem:[%s644_s5 + $0x50] sm:$0xff] %v349_v12  ;;  %366 = vst [vmem:[%s644_s5 + $0x58] sm:$0xff] %v350_v13 }
 0x2f1   :  { %v338_v21 = vpop.permute.xlu1 %337 }
 0x2f2   :  { %v353_v53 = vmul.f32 %v338_v21, %v525_v18  ;;  %v354_v54 = vmul.f32 %v338_v21, %v530_v19 }
 0x2f4   :  { %369 = vst [vmem:[%s644_s5 + $0x70] sm:$0xff] %v353_v53  ;;  %370 = vst [vmem:[%s644_s5 + $0x78] sm:$0xff] %v354_v54 }

</bundles_post_ra>
